<compile_context>
chip_gen: v7x
topology: tpu7x:2x2x1
jax: 0.10.0
libtpu: 0.0.40
codegen_flags: <defaults>
</compile_context>

<pallas_src>
import jax
import jax.numpy as jnp
from jax.experimental import pallas as pl
from jax.experimental.pallas import tpu as pltpu


# ---------------- Pallas kernel ----------------

def _double_conv_kernel(x_ref, w1_ref, b1_ref, w2_ref, b2_ref, o_ref):
    """One block of Nb samples per grid step (unpadded channels).

    x_ref : (Nb, L, Cin)        input tile (NLC, channel contraction on lanes)
    wK_ref: (3, Cin, Cout)      conv weights, tap-major (tap0=x[l-1], 1=x[l], 2=x[l+1]),
                                BatchNorm scale pre-folded
    bK_ref: (1, Cout)           folded BatchNorm bias (f32)
    o_ref : (Nb, L, Cout)
    """
    nb, L, cin = x_ref.shape
    cout = o_ref.shape[2]
    rows = nb * L

    x = x_ref[...].reshape(rows, cin)   # free re-view (leading dims merged)

    # Per-sample boundary masks, computed ONCE and shared by both stages
    # (JAX does not CSE these broadcasts across the two stage() calls).
    l_idx = jax.lax.broadcasted_iota(jnp.int32, (rows, 1), 0) % L
    is_first = l_idx == 0
    is_last = l_idx == L - 1

    def stage(h, w_ref, b_ref):
        # k=3 / padding=1 conv as three shifted matmuls.  Shifted operands come
        # from an XLU roll over the row axis plus the per-sample boundary mask,
        # so samples packed in one block never bleed into each other.
        h_prev = jnp.where(is_first, 0.0, pltpu.roll(h, shift=1, axis=0))
        h_next = jnp.where(is_last, 0.0, pltpu.roll(h, shift=rows - 1, axis=0))
        y = (jnp.dot(h_prev, w_ref[0], preferred_element_type=jnp.float32)
             + jnp.dot(h, w_ref[1], preferred_element_type=jnp.float32)
             + jnp.dot(h_next, w_ref[2], preferred_element_type=jnp.float32))
        # BN scale already folded into the weights; bias + ReLU in f32.
        return jnp.maximum(y + b_ref[...].astype(jnp.float32), 0.0)

    h1 = stage(x, w1_ref, b1_ref).astype(x.dtype)   # stage-2 MXU inputs in x dtype
    h2 = stage(h1, w2_ref, b2_ref)
    o_ref[...] = h2.reshape(nb, L, cout).astype(o_ref.dtype)


# ---------------- wrapper ----------------

def _fold_bn_into_conv(w_oik, gamma, beta, mean, var, eps=1e-5):
    """PyTorch Conv1d weight (Cout, Cin, 3) + BatchNorm1d(eval) ->
    BN-scale-folded tap-major weights (3, Cin, Cout) and bias (1, Cout)."""
    scale = gamma / jnp.sqrt(var + eps)                              # (Cout,)
    bias = beta - mean * scale                                       # (Cout,)
    w_kio = jnp.transpose(w_oik, (2, 1, 0)) * scale[None, None, :]   # (3, Cin, Cout)
    return w_kio, bias[None, :]


def double_conv_pallas(x_ncl, w1_oik, bn1, w2_oik, bn2, *, batch_block=None):
    """x_ncl: (N, Cin, L) in the PyTorch Conv1d layout -> (N, Cout, L)."""
    N, Cin, L = x_ncl.shape
    Cmid = w1_oik.shape[0]
    Cout = w2_oik.shape[0]
    cdt = x_ncl.dtype

    # Fold eval-mode BN into the conv weights; MXU operands in the activation
    # dtype (bf16-ready), bias kept in f32 (added post-accumulation).
    w1_p, b1_p = _fold_bn_into_conv(w1_oik, *bn1)
    w2_p, b2_p = _fold_bn_into_conv(w2_oik, *bn2)
    w1_p = w1_p.astype(cdt)
    w2_p = w2_p.astype(cdt)
    b1_p = b1_p.astype(jnp.float32)
    b2_p = b2_p.astype(jnp.float32)

    # Single layout op on the input: NCL -> NLC so the channel contraction sits
    # on the lane (last) dim.  No zero-padded HBM copies.
    x_nlc = jnp.transpose(x_ncl, (0, 2, 1))

    # Pack samples per grid step so each MXU call sees a decently tall M, but
    # keep >= 2 grid steps when N >= 2 (v7x megacore / DMA-compute overlap).
    if batch_block is None:
        row_target = 256 if jnp.dtype(cdt).itemsize >= 4 else 512
        batch_block = max(1, min(N, pl.cdiv(row_target, L)))
        if N >= 2 and pl.cdiv(N, batch_block) < 2:
            batch_block = pl.cdiv(N, 2)
    nb = batch_block
    grid_n = pl.cdiv(N, nb)

    # VMEM budget: double-buffered in/out blocks + both (double-buffered) weight
    # stages + f32 stage temporaries, 2x headroom, capped at 32 MiB (scoped-safe
    # on v7x's 64 MiB physical VMEM; well under v5e/v6e's 128 MiB).
    itm = jnp.dtype(cdt).itemsize
    rows = nb * L
    act_bytes = 2 * rows * (Cin + Cout) * itm
    wgt_bytes = 2 * (3 * Cin * Cmid + 3 * Cmid * Cout) * itm + 2 * (Cmid + Cout) * 4
    tmp_bytes = 6 * rows * max(Cin, Cmid, Cout) * 4
    vmem_budget = int(min(32 * 2**20,
                          max(16 * 2**20, 2 * (act_bytes + wgt_bytes + tmp_bytes))))

    out_nlc = pl.pallas_call(
        _double_conv_kernel,
        out_shape=jax.ShapeDtypeStruct((N, L, Cout), cdt),
        grid_spec=pltpu.PrefetchScalarGridSpec(
            num_scalar_prefetch=0,
            grid=(grid_n,),
            in_specs=[
                pl.BlockSpec((nb, L, Cin), lambda n: (n, 0, 0)),
                # grid-invariant weights / biases (constant index_map -> DMA'd once)
                pl.BlockSpec((3, Cin, Cmid), lambda n: (0, 0, 0)),
                pl.BlockSpec((1, Cmid), lambda n: (0, 0)),
                pl.BlockSpec((3, Cmid, Cout), lambda n: (0, 0, 0)),
                pl.BlockSpec((1, Cout), lambda n: (0, 0)),
            ],
            out_specs=pl.BlockSpec((nb, L, Cout), lambda n: (n, 0, 0)),
        ),
        compiler_params=pltpu.CompilerParams(
            dimension_semantics=("parallel",),
            vmem_limit_bytes=vmem_budget,
        ),
    )(x_nlc, w1_p, b1_p, w2_p, b2_p)

    # Back to the PyTorch NCL layout (single transpose; a downstream consumer
    # that wants NLC can skip this).
    return jnp.transpose(out_nlc, (0, 2, 1))


# ---------------- parameter setup (deterministic, synthetic) ----------------

def make_params(key, in_channels, mid_channels, out_channels):
    ks = jax.random.split(key, 10)
    # PyTorch Conv1d weight layout: (out, in, K)
    w1 = jax.random.normal(ks[0], (mid_channels, in_channels, 3), jnp.float32) * 0.2
    w2 = jax.random.normal(ks[1], (out_channels, mid_channels, 3), jnp.float32) * 0.2
    bn1 = (1.0 + 0.1 * jax.random.normal(ks[2], (mid_channels,), jnp.float32),    # gamma
           0.1 * jax.random.normal(ks[3], (mid_channels,), jnp.float32),          # beta
           0.1 * jax.random.normal(ks[4], (mid_channels,), jnp.float32),          # running mean
           jnp.abs(jax.random.normal(ks[5], (mid_channels,), jnp.float32)) + 0.5)  # running var
    bn2 = (1.0 + 0.1 * jax.random.normal(ks[6], (out_channels,), jnp.float32),
           0.1 * jax.random.normal(ks[7], (out_channels,), jnp.float32),
           0.1 * jax.random.normal(ks[8], (out_channels,), jnp.float32),
           jnp.abs(jax.random.normal(ks[9], (out_channels,), jnp.float32)) + 0.5)
    return w1, bn1, w2, bn2


# ---------------- pure-JAX reference (NCL, mirrors PyTorch eval mode) ----------------

def double_conv_ref(x_ncl, w1_oik, bn1, w2_oik, bn2, eps=1e-5):
    def stage(h, w_oik, gamma, beta, mean, var):
        y = jax.lax.conv_general_dilated(
            h, w_oik, window_strides=(1,), padding=((1, 1),),
            dimension_numbers=("NCH", "OIH", "NCH"))
        scale = gamma / jnp.sqrt(var + eps)
        bias = beta - mean * scale
        y = y * scale[None, :, None] + bias[None, :, None]
        return jnp.maximum(y, 0.0)
    return stage(stage(x_ncl, w1_oik, *bn1), w2_oik, *bn2)


if __name__ == "__main__":
    N, Cin, Cmid, Cout, L = 2, 4, 8, 8, 16

    key = jax.random.PRNGKey(0)
    kx, kp, kx2 = jax.random.split(key, 3)
    x_ncl = jax.random.normal(kx, (N, Cin, L), jnp.float32)   # PyTorch NCL input
    w1, bn1, w2, bn2 = make_params(kp, Cin, Cmid, Cout)

    out = double_conv_pallas(x_ncl, w1, bn1, w2, bn2)
    jax.block_until_ready(out)

    ref = double_conv_ref(x_ncl, w1, bn1, w2, bn2)
    assert out.shape == (N, Cout, L)
    assert jnp.allclose(out, ref, atol=1e-4, rtol=1e-4), "mismatch vs reference"

    # Padded-final-block path: N not divisible by batch_block (checks that OOB
    # rows in the last grid block never bleed into valid samples).
    x3 = jax.random.normal(kx2, (3, Cin, L), jnp.float32)
    out3 = double_conv_pallas(x3, w1, bn1, w2, bn2, batch_block=2)
    jax.block_until_ready(out3)
    ref3 = double_conv_ref(x3, w1, bn1, w2, bn2)
    assert out3.shape == (3, Cout, L)
    assert jnp.allclose(out3, ref3, atol=1e-4, rtol=1e-4), "mismatch (padded block)"

    print("KERNEL_OK")
</pallas_src>

<mosaic_0001>
module attributes {stable_mosaic.version = 11 : i64} {
  func.func @_double_conv_kernel(%arg0: i32, %arg1: memref<1x16x4xf32, #tpu.memory_space<vmem>>, %arg2: memref<3x4x8xf32, #tpu.memory_space<vmem>>, %arg3: memref<1x8xf32, #tpu.memory_space<vmem>>, %arg4: memref<3x8x8xf32, #tpu.memory_space<vmem>>, %arg5: memref<1x8xf32, #tpu.memory_space<vmem>>, %arg6: memref<1x16x8xf32, #tpu.memory_space<vmem>>) attributes {dimension_semantics = [#tpu.dimension_semantics<parallel>], iteration_bounds = array<i64: 2>, scalar_prefetch = 0 : i64, scratch_operands = 0 : i64, tpu.core_type = #tpu.core_type<tc>, window_params = [{transform_indices = @transform_0, window_bounds = array<i64: 1, 16, 4>}, {pipeline_mode = #tpu.pipeline_mode<synchronous>, transform_indices = @transform_1, window_bounds = array<i64: 3, 4, 8>}, {pipeline_mode = #tpu.pipeline_mode<synchronous>, transform_indices = @transform_2, window_bounds = array<i64: 1, 8>}, {pipeline_mode = #tpu.pipeline_mode<synchronous>, transform_indices = @transform_3, window_bounds = array<i64: 3, 8, 8>}, {pipeline_mode = #tpu.pipeline_mode<synchronous>, transform_indices = @transform_4, window_bounds = array<i64: 1, 8>}, {transform_indices = @transform_5, window_bounds = array<i64: 1, 16, 8>}]} {
    %c0 = arith.constant 0 : index
    %c0_0 = arith.constant 0 : index
    %c0_1 = arith.constant 0 : index
    %0 = vector.load %arg1[%c0, %c0_0, %c0_1] : memref<1x16x4xf32, #tpu.memory_space<vmem>>, vector<1x16x4xf32>
    %1 = vector.shape_cast %0 : vector<1x16x4xf32> to vector<16x4xf32>
    %2 = tpu.iota {dimensions = array<i32: 0>} : vector<16x1xi32>
    %c16_i32 = arith.constant 16 : i32
    %c0_i32 = arith.constant 0 : i32
    %3 = arith.cmpi eq, %c16_i32, %c0_i32 : i32
    %c1_i32 = arith.constant 1 : i32
    %4 = arith.select %3, %c1_i32, %c16_i32 : i32
    %5 = vector.broadcast %4 : i32 to vector<16x1xi32>
    %6 = arith.remsi %2, %5 : vector<16x1xi32>
    %c0_i32_2 = arith.constant 0 : i32
    %7 = vector.broadcast %c0_i32_2 : i32 to vector<16x1xi32>
    %8 = arith.cmpi ne, %6, %7 : vector<16x1xi32>
    %c0_i32_3 = arith.constant 0 : i32
    %9 = vector.broadcast %c0_i32_3 : i32 to vector<16x1xi32>
    %10 = arith.cmpi slt, %6, %9 : vector<16x1xi32>
    %c0_i32_4 = arith.constant 0 : i32
    %11 = arith.cmpi slt, %4, %c0_i32_4 : i32
    %12 = vector.broadcast %11 : i1 to vector<16x1xi1>
    %13 = vector.broadcast %12 : vector<16x1xi1> to vector<16x1xi1>
    %14 = arith.xori %10, %13 : vector<16x1xi1>
    %15 = arith.andi %14, %8 : vector<16x1xi1>
    %16 = vector.broadcast %4 : i32 to vector<16x1xi32>
    %17 = arith.addi %6, %16 : vector<16x1xi32>
    %18 = arith.select %15, %17, %6 : vector<16x1xi1>, vector<16x1xi32>
    %c0_i32_5 = arith.constant 0 : i32
    %19 = vector.broadcast %c0_i32_5 : i32 to vector<16x1xi32>
    %20 = arith.cmpi eq, %18, %19 : vector<16x1xi32>
    %c15_i32 = arith.constant 15 : i32
    %21 = vector.broadcast %c15_i32 : i32 to vector<16x1xi32>
    %22 = arith.cmpi eq, %18, %21 : vector<16x1xi32>
    %c1_i32_6 = arith.constant 1 : i32
    %23 = tpu.dynamic_rotate %1 by %c1_i32_6 dim 0 : vector<16x4xf32>, i32 -> vector<16x4xf32>
    %cst = arith.constant 0.000000e+00 : f32
    %24 = vector.shape_cast %20 : vector<16x1xi1> to vector<16x1xi1>
    %25 = vector.broadcast %24 : vector<16x1xi1> to vector<16x4xi1>
    %26 = vector.broadcast %cst : f32 to vector<16x4xf32>
    %27 = arith.select %25, %26, %23 : vector<16x4xi1>, vector<16x4xf32>
    %c15_i32_7 = arith.constant 15 : i32
    %28 = tpu.dynamic_rotate %1 by %c15_i32_7 dim 0 : vector<16x4xf32>, i32 -> vector<16x4xf32>
    %cst_8 = arith.constant 0.000000e+00 : f32
    %29 = vector.shape_cast %22 : vector<16x1xi1> to vector<16x1xi1>
    %30 = vector.broadcast %29 : vector<16x1xi1> to vector<16x4xi1>
    %31 = vector.broadcast %cst_8 : f32 to vector<16x4xf32>
    %32 = arith.select %30, %31, %28 : vector<16x4xi1>, vector<16x4xf32>
    %c0_9 = arith.constant 0 : index
    %c0_10 = arith.constant 0 : index
    %c0_11 = arith.constant 0 : index
    %33 = vector.load %arg2[%c0_9, %c0_10, %c0_11] : memref<3x4x8xf32, #tpu.memory_space<vmem>>, vector<1x4x8xf32>
    %34 = vector.shape_cast %33 : vector<1x4x8xf32> to vector<4x8xf32>
    %cst_12 = arith.constant dense<0.000000e+00> : vector<16x8xf32>
    %35 = tpu.matmul %27, %34, %cst_12 {dimension_numbers = #tpu.dot_dimension_numbers<[1], [0], [0], [1], [0, 0, 1, 1], [], []>} : vector<16x4xf32>, vector<4x8xf32>, vector<16x8xf32> -> vector<16x8xf32>
    %c1 = arith.constant 1 : index
    %c0_13 = arith.constant 0 : index
    %c0_14 = arith.constant 0 : index
    %36 = vector.load %arg2[%c1, %c0_13, %c0_14] : memref<3x4x8xf32, #tpu.memory_space<vmem>>, vector<1x4x8xf32>
    %37 = vector.shape_cast %36 : vector<1x4x8xf32> to vector<4x8xf32>
    %cst_15 = arith.constant dense<0.000000e+00> : vector<16x8xf32>
    %38 = tpu.matmul %1, %37, %cst_15 {dimension_numbers = #tpu.dot_dimension_numbers<[1], [0], [0], [1], [0, 0, 1, 1], [], []>} : vector<16x4xf32>, vector<4x8xf32>, vector<16x8xf32> -> vector<16x8xf32>
    %39 = arith.addf %35, %38 : vector<16x8xf32>
    %c2 = arith.constant 2 : index
    %c0_16 = arith.constant 0 : index
    %c0_17 = arith.constant 0 : index
    %40 = vector.load %arg2[%c2, %c0_16, %c0_17] : memref<3x4x8xf32, #tpu.memory_space<vmem>>, vector<1x4x8xf32>
    %41 = vector.shape_cast %40 : vector<1x4x8xf32> to vector<4x8xf32>
    %cst_18 = arith.constant dense<0.000000e+00> : vector<16x8xf32>
    %42 = tpu.matmul %32, %41, %cst_18 {dimension_numbers = #tpu.dot_dimension_numbers<[1], [0], [0], [1], [0, 0, 1, 1], [], []>} : vector<16x4xf32>, vector<4x8xf32>, vector<16x8xf32> -> vector<16x8xf32>
    %43 = arith.addf %39, %42 : vector<16x8xf32>
    %c0_19 = arith.constant 0 : index
    %c0_20 = arith.constant 0 : index
    %44 = vector.load %arg3[%c0_19, %c0_20] : memref<1x8xf32, #tpu.memory_space<vmem>>, vector<1x8xf32>
    %45 = vector.broadcast %44 : vector<1x8xf32> to vector<16x8xf32>
    %46 = arith.addf %43, %45 : vector<16x8xf32>
    %cst_21 = arith.constant 0.000000e+00 : f32
    %47 = vector.broadcast %cst_21 : f32 to vector<16x8xf32>
    %48 = arith.maximumf %46, %47 : vector<16x8xf32>
    %c1_i32_22 = arith.constant 1 : i32
    %49 = tpu.dynamic_rotate %48 by %c1_i32_22 dim 0 : vector<16x8xf32>, i32 -> vector<16x8xf32>
    %cst_23 = arith.constant 0.000000e+00 : f32
    %50 = vector.shape_cast %20 : vector<16x1xi1> to vector<16x1xi1>
    %51 = vector.broadcast %50 : vector<16x1xi1> to vector<16x8xi1>
    %52 = vector.broadcast %cst_23 : f32 to vector<16x8xf32>
    %53 = arith.select %51, %52, %49 : vector<16x8xi1>, vector<16x8xf32>
    %c15_i32_24 = arith.constant 15 : i32
    %54 = tpu.dynamic_rotate %48 by %c15_i32_24 dim 0 : vector<16x8xf32>, i32 -> vector<16x8xf32>
    %cst_25 = arith.constant 0.000000e+00 : f32
    %55 = vector.shape_cast %22 : vector<16x1xi1> to vector<16x1xi1>
    %56 = vector.broadcast %55 : vector<16x1xi1> to vector<16x8xi1>
    %57 = vector.broadcast %cst_25 : f32 to vector<16x8xf32>
    %58 = arith.select %56, %57, %54 : vector<16x8xi1>, vector<16x8xf32>
    %c0_26 = arith.constant 0 : index
    %c0_27 = arith.constant 0 : index
    %c0_28 = arith.constant 0 : index
    %59 = vector.load %arg4[%c0_26, %c0_27, %c0_28] : memref<3x8x8xf32, #tpu.memory_space<vmem>>, vector<1x8x8xf32>
    %60 = vector.shape_cast %59 : vector<1x8x8xf32> to vector<8x8xf32>
    %cst_29 = arith.constant dense<0.000000e+00> : vector<16x8xf32>
    %61 = tpu.matmul %53, %60, %cst_29 {dimension_numbers = #tpu.dot_dimension_numbers<[1], [0], [0], [1], [0, 0, 1, 1], [], []>} : vector<16x8xf32>, vector<8x8xf32>, vector<16x8xf32> -> vector<16x8xf32>
    %c1_30 = arith.constant 1 : index
    %c0_31 = arith.constant 0 : index
    %c0_32 = arith.constant 0 : index
    %62 = vector.load %arg4[%c1_30, %c0_31, %c0_32] : memref<3x8x8xf32, #tpu.memory_space<vmem>>, vector<1x8x8xf32>
    %63 = vector.shape_cast %62 : vector<1x8x8xf32> to vector<8x8xf32>
    %cst_33 = arith.constant dense<0.000000e+00> : vector<16x8xf32>
    %64 = tpu.matmul %48, %63, %cst_33 {dimension_numbers = #tpu.dot_dimension_numbers<[1], [0], [0], [1], [0, 0, 1, 1], [], []>} : vector<16x8xf32>, vector<8x8xf32>, vector<16x8xf32> -> vector<16x8xf32>
    %65 = arith.addf %61, %64 : vector<16x8xf32>
    %c2_34 = arith.constant 2 : index
    %c0_35 = arith.constant 0 : index
    %c0_36 = arith.constant 0 : index
    %66 = vector.load %arg4[%c2_34, %c0_35, %c0_36] : memref<3x8x8xf32, #tpu.memory_space<vmem>>, vector<1x8x8xf32>
    %67 = vector.shape_cast %66 : vector<1x8x8xf32> to vector<8x8xf32>
    %cst_37 = arith.constant dense<0.000000e+00> : vector<16x8xf32>
    %68 = tpu.matmul %58, %67, %cst_37 {dimension_numbers = #tpu.dot_dimension_numbers<[1], [0], [0], [1], [0, 0, 1, 1], [], []>} : vector<16x8xf32>, vector<8x8xf32>, vector<16x8xf32> -> vector<16x8xf32>
    %69 = arith.addf %65, %68 : vector<16x8xf32>
    %c0_38 = arith.constant 0 : index
    %c0_39 = arith.constant 0 : index
    %70 = vector.load %arg5[%c0_38, %c0_39] : memref<1x8xf32, #tpu.memory_space<vmem>>, vector<1x8xf32>
    %71 = vector.broadcast %70 : vector<1x8xf32> to vector<16x8xf32>
    %72 = arith.addf %69, %71 : vector<16x8xf32>
    %cst_40 = arith.constant 0.000000e+00 : f32
    %73 = vector.broadcast %cst_40 : f32 to vector<16x8xf32>
    %74 = arith.maximumf %72, %73 : vector<16x8xf32>
    %75 = vector.shape_cast %74 : vector<16x8xf32> to vector<1x16x8xf32>
    %c0_41 = arith.constant 0 : index
    %c0_42 = arith.constant 0 : index
    %c0_43 = arith.constant 0 : index
    %76 = vector.load %arg6[%c0_41, %c0_42, %c0_43] : memref<1x16x8xf32, #tpu.memory_space<vmem>>, vector<1x16x8xf32>
    tpu.vector_store %arg6[%c0_41, %c0_42, %c0_43], %75 {strides = array<i32>} : memref<1x16x8xf32, #tpu.memory_space<vmem>>, vector<1x16x8xf32>,
    return
  }
  func.func @transform_0(%arg0: i32) -> (i32, i32, i32) {
    %c0_i32 = arith.constant 0 : i32
    %c0_i32_0 = arith.constant 0 : i32
    %c0_i32_1 = arith.constant 0 : i32
    return %arg0, %c0_i32, %c0_i32_0 : i32, i32, i32
  }
  func.func @transform_1(%arg0: i32) -> (i32, i32, i32) {
    %c0_i32 = arith.constant 0 : i32
    %c0_i32_0 = arith.constant 0 : i32
    %c0_i32_1 = arith.constant 0 : i32
    %c0_i32_2 = arith.constant 0 : i32
    return %c0_i32, %c0_i32_0, %c0_i32_1 : i32, i32, i32
  }
  func.func @transform_2(%arg0: i32) -> (i32, i32) {
    %c0_i32 = arith.constant 0 : i32
    %c0_i32_0 = arith.constant 0 : i32
    %c0_i32_1 = arith.constant 0 : i32
    return %c0_i32, %c0_i32_0 : i32, i32
  }
  func.func @transform_3(%arg0: i32) -> (i32, i32, i32) {
    %c0_i32 = arith.constant 0 : i32
    %c0_i32_0 = arith.constant 0 : i32
    %c0_i32_1 = arith.constant 0 : i32
    %c0_i32_2 = arith.constant 0 : i32
    return %c0_i32, %c0_i32_0, %c0_i32_1 : i32, i32, i32
  }
  func.func @transform_4(%arg0: i32) -> (i32, i32) {
    %c0_i32 = arith.constant 0 : i32
    %c0_i32_0 = arith.constant 0 : i32
    %c0_i32_1 = arith.constant 0 : i32
    return %c0_i32, %c0_i32_0 : i32, i32
  }
  func.func @transform_5(%arg0: i32) -> (i32, i32, i32) {
    %c0_i32 = arith.constant 0 : i32
    %c0_i32_0 = arith.constant 0 : i32
    %c0_i32_1 = arith.constant 0 : i32
    return %arg0, %c0_i32, %c0_i32_0 : i32, i32, i32
  }
}

</mosaic_0001>

<bundles_post_ra>
// kernel: tpu_custom_call.1
= control target key start
LH: loop header
LB: loop body
LE: loop exit
PB: predicated region body
PF: predicated region fallthrough
CT: control target
= control target key end

     0   :  { %s1019_s18 = smov 0   ;;  %s1111_s0 = inlined_call_operand.vmem [shape: f32[2,16,4], index: 0, kind: input, shape index: {}]   ;;  %s1112_s1 = inlined_call_operand.vmem [shape: f32[3,4,8], index: 1, kind: input, shape index: {}]   ;;  %s1113_s2 = inlined_call_operand.vmem [shape: f32[1,8], index: 2, kind: input, shape index: {}]   ;;  %s1114_s3 = inlined_call_operand.vmem [shape: f32[3,8,8], index: 3, kind: input, shape index: {}]   ;;  %s1115_s4 = inlined_call_operand.vmem [shape: f32[1,8], index: 4, kind: input, shape index: {}]   ;;  %s1116_s5 = inlined_call_operand.vmem [shape: f32[2,16,8], index: 5, kind: output, shape index: {}]  }
   0x1 LB: > { %s883_s19 = sadd.s32 4294967295, %s987_s18   ;;  %p887_p0 = scmp.ge.s32.totalorder %s987_s18, 1  ;;  %s987_s18 = sphi %s1019_s18, %s15_s18  }
   0x2   : > { %p187_p1 = scmp.lt.s32.totalorder %s987_s18, 3 }
   0x4   : > { %p188_p2 = pnand %p887_p0, %p187_p1 }
   0x5   : > { %v892_v0 = vld [vmem:[%s1112_s1 + $0x4] sm:$0xf] (!%p188_p2)  ;;  %vm290_vm0 = vcmask (!%p188_p2), 1043456   ;;  %p215_p3 = scmp.lt.s32.totalorder (!%p188_p2), %s883_s19, 1  ;;  %v227_v1 = vlaneseq (!%p188_p2)  ;;  %v280_v2 = vld [vmem:[%s1112_s1] sm:$0xf] (!%p188_p2) }
   0x6   : > { %191 = sbr.rel (%p188_p2) target bundleno = 486 (0x1e6), region = 40  ;;  %935 = vmatprep.subr.msk.mxu0 (!%p188_p2), %vm290_vm0, %v892_v0  ;;  %vm283_vm1 = vcmask (!%p188_p2), 31744   ;;  %v899_v10 = vld [vmem:[%s1112_s1 + $0x8] sm:$0xf] (!%p188_p2)  ;;  %v564_v23 = vld [vmem:[%s1114_s3] sm:$0xff] (!%p188_p2)  ;;  %vm567_vm6 = vcmask (!%p188_p2), 64512  }
   0x7   : > { %936 = vmatpush3.msk.msra.mxu0 (!%p188_p2), %vm290_vm0, %v892_v0  ;;  %v228_v3 = vshrl.u32 (!%p188_p2), %v227_v1, 7  ;;  %v904_v22 = vld [vmem:[%s1114_s3 + $0x8] sm:$0xff] (!%p188_p2)  ;;  %v903_v24 = vld [vmem:[%s1113_s2] ss:$0 sm:$0xff] (!%p188_p2)  ;;  %v909_v35 = vld [vmem:[%s1114_s3 + $0x10] sm:$0xff] (!%p188_p2) }
   0x8   : > { %940 = vmatprep.subr.msk.mxu0 (!%p188_p2), %vm290_vm0, %v280_v2  ;;  %950 = vmatprep.subr.mxu1 (!%p188_p2), %v904_v22  ;;  %v912_v42 = vld [vmem:[%s1115_s4] ss:$0 sm:$0xff] (!%p188_p2) }
   0x9   : > { %v234_v4 = vand.u32 (!%p188_p2), 15, %v228_v3  ;;  %vm260_vm2 = vcmp.lt.s32.totalorder (!%p188_p2), %v228_v3, 1  ;;  %v229_v15 = vadd.s32 (!%p188_p2), 8, %v228_v3  ;;  %vm271_vm4 = vcmp.lt.s32.totalorder (!%p188_p2), %v228_v3, 7  ;;  %951 = vmatpush3.msra.mxu1 (!%p188_p2), %v904_v22 }
   0xa   : > { %955 = vmatprep.subr.mxu1 (!%p188_p2), %v564_v23 }
   0xb   : > { %vm1045_vm3 = vcmp.eq.s32.totalorder (!%p188_p2), %v234_v4, 0  ;;  %v241_v18 = vand.u32 (!%p188_p2), 15, %v229_v15 }
   0xd   : > { %s1122_s19 = smov (!%p215_p3, %s883_s19), 1  ;;  %vm1064_vm5 = vcmp.eq.s32.totalorder %v241_v18, 15 }
   0xe   : > { %s915_s24 = sshll.u32 %s1122_s19, 4 }
   0xf   : > { %s219_s27 = scalar_lea.vmem %s1111_s0, %s915_s24  ;;  %s224_s17 = scalar_lea.vmem %s1116_s5, %s915_s24 }
  0x10   : > { %v225_v5 = vld [vmem:[%s219_s27] sm:$0xff]  ;;  %v226_v6 = vld [vmem:[%s219_s27 + $0x8] sm:$0xff] }
  0x11   : > { %v258_v7 = vrot.slane %v225_v5, 7  ;;  %937 = vmatprep.mubr.msk.f32.mxu0 %vm283_vm1, %v225_v5  ;;  %v259_v8 = vrot.slane %v226_v6, 7  ;;  %v269_v12 = vrot.slane %v225_v5, 1  ;;  %v270_v13 = vrot.slane %v226_v6, 1 }
  0x12   : > { %938 = vmatmul.mubr.msk.f32.vlgmr.msra.gmra.mrb[0].mxu0 %vm283_vm1, %v226_v6 }
  0x13   : > { %941 = vmatpush3.msk.msra.mxu0 %vm290_vm0, %v280_v2  ;;  %v262_v11 = vsel %vm260_vm2, %v259_v8, %v258_v7  ;;  %v261_v16 = vsel %vm260_vm2, %v258_v7, %v259_v8  ;;  %v272_v17 = vsel %vm271_vm4, %v269_v12, %v270_v13  ;;  %v273_v20 = vsel %vm271_vm4, %v270_v13, %v269_v12 }
  0x14   : > { %v267_v14 = vsel %vm1045_vm3, 0.0, %v262_v11  ;;  %945 = vmatprep.subr.msk.mxu0 %vm290_vm0, %v899_v10  ;;  %v279_v21 = vsel %vm1064_vm5, 0.0, %v273_v20 }
  0x15   : > { %942 = vmatprep.mubr.msk.f32.mxu0 %vm283_vm1, %v267_v14 }
  0x1a   : > { %943 = vmatmul.mubr.msk.f32.vlgmr.msra.gmra.mrb[0].mxu0 %vm283_vm1, %v261_v16 }
  0x1b   : > { %946 = vmatpush3.msk.msra.mxu0 %vm290_vm0, %v899_v10  ;;  %947 = vmatprep.mubr.msk.f32.mxu0 %vm283_vm1, %v272_v17 }
  0x22   : > { %948 = vmatmul.mubr.msk.f32.vlgmr.msra.gmra.mrb[0].mxu0 %vm283_vm1, %v279_v21 }
  0xf5   : > { %v949_v25 = vpop.f32.mrb[0].mxu0 }
  0xf6   : > { %v549_v26 = vadd.f32 %v949_v25, %v903_v24  ;;  %v530_v27 = vpop.f32.mrb[1].mxu0 }
  0xf7   : > { %v548_v28 = vadd.f32 %v903_v24, %v530_v27 }
  0xf8   : > { %v551_v29 = vmax.f32 %v549_v26, 0.0 }
  0xf9   : > { %v550_v30 = vmax.f32 %v548_v28, 0.0 }
  0xfa   : > { %v553_v31 = vrot.slane %v551_v29, 7  ;;  %v559_v32 = vrot.slane %v551_v29, 1 }
  0xfb   : > { %v552_v33 = vrot.slane %v550_v30, 7  ;;  %v558_v34 = vrot.slane %v550_v30, 1  ;;  %952 = vmatprep.mubr.msk.f32.mxu1 %vm567_vm6, %v550_v30 }
  0xfc   : > { %953 = vmatmul.mubr.msk.f32.vlgmr.msra.gmra.mrb[0].mxu1 %vm567_vm6, %v551_v29 }
  0xfd   : > { %956 = vmatpush3.msra.mxu1 %v564_v23  ;;  %v555_v36 = vsel %vm260_vm2, %v553_v31, %v552_v33  ;;  %v554_v37 = vsel %vm260_vm2, %v552_v33, %v553_v31  ;;  %v560_v38 = vsel %vm271_vm4, %v558_v34, %v559_v32  ;;  %v561_v39 = vsel %vm271_vm4, %v559_v32, %v558_v34 }
  0xfe   : > { %v556_v40 = vsel %vm1045_vm3, 0.0, %v555_v36  ;;  %960 = vmatprep.subr.mxu1 %v909_v35  ;;  %v563_v41 = vsel %vm1064_vm5, 0.0, %v561_v39 }
  0xff   : > { %957 = vmatprep.mubr.msk.f32.mxu1 %vm567_vm6, %v556_v40 }
 0x104   : > { %958 = vmatmul.mubr.msk.f32.vlgmr.msra.gmra.mrb[0].mxu1 %vm567_vm6, %v554_v37 }
 0x105   : > { %961 = vmatpush3.msra.mxu1 %v909_v35  ;;  %962 = vmatprep.mubr.msk.f32.mxu1 %vm567_vm6, %v560_v38 }
 0x10c   : > { %963 = vmatmul.mubr.msk.f32.vlgmr.msra.gmra.mrb[0].mxu1 %vm567_vm6, %v563_v41 }
 0x1df   : > { %v964_v43 = vpop.f32.mrb[0].mxu1 }
 0x1e0   : > { %v823_v44 = vadd.f32 %v964_v43, %v912_v42  ;;  %v804_v45 = vpop.f32.mrb[1].mxu1 }
 0x1e1   : > { %v822_v46 = vadd.f32 %v912_v42, %v804_v45 }
 0x1e2   : > { %v825_v47 = vmax.f32 %v823_v44, 0.0 }
 0x1e3   : > { %v824_v48 = vmax.f32 %v822_v46, 0.0 }
 0x1e4   : > { %827 = vst.msk [vmem:[%s224_s17 + $0x8] sm:$0xff] %vm567_vm6, %v825_v47 }
 0x1e5   : > { %826 = vst.msk [vmem:[%s224_s17] sm:$0xff] %vm567_vm6, %v824_v48 }
 0x1e6 PF: > { %s15_s18 = sadd.s32 1, %s987_s18  }
 0x1e7   : > { %p12_p4 = scmp.ge.s32.totalorder %s15_s18, 4  }
 0x1e9   :  { %14 = sbr.rel (!%p12_p4) target bundleno = 1 (0x1), region = 74 }

</bundles_post_ra>
